<compile_context>
chip_gen: v7x
topology: tpu7x:2x2x1
jax: 0.10.0
libtpu: 0.0.40
codegen_flags: <defaults>
</compile_context>

<pallas_src>
import math
from functools import partial

import jax
import jax.numpy as jnp
from jax.experimental import pallas as pl
from jax.experimental.pallas import tpu as pltpu

# > v5e (16 MiB) / v6e,v7x (32 MiB) default scoped limits, < v7x 64 MiB physical.
_VMEM_LIMIT_BYTES = 48 * 1024 * 1024
_NEG_INF = -1e30


# ----------------------------------------------------------------------------
# Kernel 1: row x column tiled linear projection  out = bf16(x) @ w_t + b
# ----------------------------------------------------------------------------
def _linear_kernel(x_ref, w_ref, b_ref, o_ref):
    acc = jnp.dot(x_ref[...].astype(jnp.bfloat16), w_ref[...],
                  preferred_element_type=jnp.float32)
    o_ref[...] = (acc + b_ref[...]).astype(o_ref.dtype)


def pallas_linear(x, w_t, b, *, block_rows=512, block_cols=512):
    """x: (N, K), w_t: (K, M) bf16 pre-transposed, b: (M,) f32 -> (N, M) bf16."""
    N, K = x.shape
    M = w_t.shape[1]
    tm = min(block_rows, N)
    tn = min(block_cols, M)
    grid = (pl.cdiv(N, tm), pl.cdiv(M, tn))
    return pl.pallas_call(
        _linear_kernel,
        out_shape=jax.ShapeDtypeStruct((N, M), jnp.bfloat16),
        grid=grid,
        in_specs=[
            pl.BlockSpec((tm, K), lambda i, j: (i, 0)),
            pl.BlockSpec((K, tn), lambda i, j: (0, j)),
            pl.BlockSpec((1, tn), lambda i, j: (0, j)),
        ],
        out_specs=pl.BlockSpec((tm, tn), lambda i, j: (i, j)),
        compiler_params=pltpu.CompilerParams(
            dimension_semantics=("parallel", "parallel"),
            vmem_limit_bytes=_VMEM_LIMIT_BYTES),
    )(x, w_t, b.reshape(1, M))


# ----------------------------------------------------------------------------
# Kernel 2: flash attention, grid (B, H, q_tiles, kv_tiles), head-major blocks
# ----------------------------------------------------------------------------
def _flash_attention_kernel(q_ref, k_ref, v_ref, o_ref, m_ref, l_ref, acc_ref,
                            *, seq_k, block_k):
    ki = pl.program_id(3)

    @pl.when(ki == 0)
    def _init():
        m_ref[...] = jnp.full(m_ref.shape, _NEG_INF, jnp.float32)
        l_ref[...] = jnp.zeros(l_ref.shape, jnp.float32)
        acc_ref[...] = jnp.zeros(acc_ref.shape, jnp.float32)

    q = q_ref[...]                                   # (tq, Dh) bf16, pre-scaled
    k = k_ref[...]                                   # (tk, Dh) bf16
    v = v_ref[...]                                   # (tk, Dh) bf16

    # scores: contract head_dim of both operands -> (tq, tk), f32 on the MXU.
    s = jax.lax.dot_general(q, k, (((1,), (1,)), ((), ())),
                            preferred_element_type=jnp.float32)

    if seq_k % block_k != 0:
        # Static ragged-tail path: mask invalid score columns; zero matching V
        # rows so exp(-inf)=0 columns cannot pick up stale-VMEM NaNs.
        col = jax.lax.broadcasted_iota(jnp.int32, s.shape, 1) + ki * block_k
        s = jnp.where(col < seq_k, s, _NEG_INF)
        row = jax.lax.broadcasted_iota(jnp.int32, v.shape, 0) + ki * block_k
        v = jnp.where(row < seq_k, v, jnp.zeros_like(v))

    m_prev = m_ref[...]
    m_new = jnp.maximum(m_prev, jnp.max(s, axis=-1, keepdims=True))
    alpha = jnp.exp(m_prev - m_new)
    p = jnp.exp(s - m_new)
    l_ref[...] = alpha * l_ref[...] + jnp.sum(p, axis=-1, keepdims=True)
    acc_ref[...] = alpha * acc_ref[...] + jax.lax.dot_general(
        p.astype(v.dtype), v, (((1,), (0,)), ((), ())),
        preferred_element_type=jnp.float32)
    m_ref[...] = m_new

    @pl.when(ki == pl.num_programs(3) - 1)
    def _finalize():
        o_ref[...] = (acc_ref[...] * pl.reciprocal(l_ref[...], approx=True)
                      ).astype(o_ref.dtype)


def pallas_attention(q_pack, kv_pack, cq, ck, cv, *, block_q=512, block_k=512):
    """q_pack: (Cq, B, H, Sq, Dh), kv_pack: (Ck, B, H, Sk, Dh), bf16 head-major.
    cq/ck/cv pick the leading chunk (zero-copy q/k/v split)."""
    _, B, H, Sq, Dh = q_pack.shape
    Sk = kv_pack.shape[3]
    tq = min(block_q, Sq)
    tk = min(block_k, Sk)
    grid = (B, H, pl.cdiv(Sq, tq), pl.cdiv(Sk, tk))
    kernel = partial(_flash_attention_kernel, seq_k=Sk, block_k=tk)
    return pl.pallas_call(
        kernel,
        out_shape=jax.ShapeDtypeStruct((B, H, Sq, Dh), jnp.bfloat16),
        grid=grid,
        in_specs=[
            pl.BlockSpec((None, None, None, tq, Dh),
                         lambda b, h, qi, ki: (cq, b, h, qi, 0)),
            pl.BlockSpec((None, None, None, tk, Dh),
                         lambda b, h, qi, ki: (ck, b, h, ki, 0)),
            pl.BlockSpec((None, None, None, tk, Dh),
                         lambda b, h, qi, ki: (cv, b, h, ki, 0)),
        ],
        out_specs=pl.BlockSpec((None, None, tq, Dh),
                               lambda b, h, qi, ki: (b, h, qi, 0)),
        scratch_shapes=[
            pltpu.VMEM((tq, 1), jnp.float32),    # running max m
            pltpu.VMEM((tq, 1), jnp.float32),    # running sum l
            pltpu.VMEM((tq, Dh), jnp.float32),   # output accumulator
        ],
        compiler_params=pltpu.CompilerParams(
            dimension_semantics=("parallel", "parallel", "parallel", "arbitrary"),
            vmem_limit_bytes=_VMEM_LIMIT_BYTES),
    )(q_pack, kv_pack, kv_pack)


# ----------------------------------------------------------------------------
# Kernel 3: fused out-projection (from head-major) + residual + LayerNorm
# ----------------------------------------------------------------------------
def _out_norm_kernel(a_ref, w_ref, b_ref, x_ref, g_ref, beta_ref, o_ref,
                     *, num_heads, eps):
    # y[t, e] = sum_h sum_d a[h, t, d] * w[h, d, e]   (== concat-heads @ W_out^T)
    y = jax.lax.dot_general(a_ref[0], w_ref[0], (((1,), (0,)), ((), ())),
                            preferred_element_type=jnp.float32)
    for h in range(1, num_heads):
        y = y + jax.lax.dot_general(a_ref[h], w_ref[h], (((1,), (0,)), ((), ())),
                                    preferred_element_type=jnp.float32)
    # TODO(synk): attention dropout and the outer nn.Dropout (p=0.1) are
    # stochastic; implemented as identity (eval-mode semantics).
    z = x_ref[...] + y + b_ref[...]
    mean = jnp.mean(z, axis=-1, keepdims=True)
    var = jnp.mean(jnp.square(z - mean), axis=-1, keepdims=True)
    zn = (z - mean) * jax.lax.rsqrt(var + eps)
    o_ref[...] = (zn * g_ref[...] + beta_ref[...]).astype(o_ref.dtype)


def pallas_out_norm(attn_hm, w_out_hm, b_out, x_bse, gamma, beta, *,
                    eps=1e-5, block_q=512):
    B, H, Sq, Dh = attn_hm.shape
    E = x_bse.shape[-1]
    tq = min(block_q, Sq)
    grid = (B, pl.cdiv(Sq, tq))
    kernel = partial(_out_norm_kernel, num_heads=H, eps=eps)
    return pl.pallas_call(
        kernel,
        out_shape=jax.ShapeDtypeStruct((B, Sq, E), jnp.float32),
        grid=grid,
        in_specs=[
            pl.BlockSpec((None, H, tq, Dh), lambda b, qi: (b, 0, qi, 0)),  # attn
            pl.BlockSpec((H, Dh, E), lambda b, qi: (0, 0, 0)),             # W_out^T
            pl.BlockSpec((1, E), lambda b, qi: (0, 0)),                    # b_out
            pl.BlockSpec((None, tq, E), lambda b, qi: (b, qi, 0)),         # residual
            pl.BlockSpec((1, E), lambda b, qi: (0, 0)),                    # ln gamma
            pl.BlockSpec((1, E), lambda b, qi: (0, 0)),                    # ln beta
        ],
        out_specs=pl.BlockSpec((None, tq, E), lambda b, qi: (b, qi, 0)),
        compiler_params=pltpu.CompilerParams(
            dimension_semantics=("parallel", "parallel"),
            vmem_limit_bytes=_VMEM_LIMIT_BYTES),
    )(attn_hm, w_out_hm, b_out.reshape(1, E), x_bse,
      gamma.reshape(1, E), beta.reshape(1, E))


# ----------------------------------------------------------------------------
# Module wrapper (mirrors PyTorch MultiHeadAttention.forward, eval mode)
# ----------------------------------------------------------------------------
def multi_head_attention_forward(x, y, params, num_heads, eps=1e-5):
    """x: (Sq, B, E), y: (Sk, B, E) or None.  Returns (Sq, B, E) float32."""
    self_attn = (y is None) or (y is x)
    S, B, E = x.shape
    H = num_heads
    Dh = E // H

    x2 = x.reshape(S * B, E)                 # free reshape, native row order
    xb = jnp.transpose(x, (1, 0, 2))         # (B, S, E) residual for fused out+LN

    if self_attn:
        # one packed GEMM for Q,K,V; q columns pre-scaled by 1/sqrt(Dh)
        qkv = pallas_linear(x2, params["w_qkv_t"], params["b_qkv"])       # (S*B, 3E) bf16
        # single bf16 relayout to head-major (3, B, H, S, Dh); replaces all
        # per-(KV tile, head) lane relayouts inside the attention kernel.
        qkv_hm = jnp.transpose(qkv.reshape(S, B, 3, H, Dh), (2, 1, 3, 0, 4))
        attn = pallas_attention(qkv_hm, qkv_hm, 0, 1, 2)                  # (B,H,S,Dh) bf16
    else:
        Sk = y.shape[0]
        y2 = y.reshape(Sk * B, E)
        q = pallas_linear(x2, params["w_q_t"], params["b_q"])             # (S*B, E) bf16
        kv = pallas_linear(y2, params["w_kv_t"], params["b_kv"])          # (Sk*B, 2E) bf16
        q_hm = jnp.transpose(q.reshape(S, B, 1, H, Dh), (2, 1, 3, 0, 4))  # (1,B,H,S,Dh)
        kv_hm = jnp.transpose(kv.reshape(Sk, B, 2, H, Dh), (2, 1, 3, 0, 4))
        attn = pallas_attention(q_hm, kv_hm, 0, 0, 1)

    out = pallas_out_norm(attn, params["w_out_hm"], params["b_out"], xb,
                          params["ln_weight"], params["ln_bias"], eps=eps)  # (B,S,E) f32
    return jnp.transpose(out, (1, 0, 2))     # back to (S, B, E)


# ----------------------------------------------------------------------------
# Params (PyTorch layout) + one-time packing / transposition / scale folding
# ----------------------------------------------------------------------------
def init_params(key, E):
    k1, k2, k3, k4 = jax.random.split(key, 4)
    bound = 1.0 / math.sqrt(E)
    return dict(
        in_proj_weight=jax.random.uniform(k1, (3 * E, E), jnp.float32, -bound, bound),
        in_proj_bias=jax.random.uniform(k3, (3 * E,), jnp.float32, -bound, bound),
        out_proj_weight=jax.random.uniform(k2, (E, E), jnp.float32, -bound, bound),
        out_proj_bias=jax.random.uniform(k4, (E,), jnp.float32, -bound, bound),
        ln_weight=jnp.ones((E,), jnp.float32),
        ln_bias=jnp.zeros((E,), jnp.float32),
    )


def prepare_params(raw, E, num_heads):
    """One-time: fold softmax scale into q weights, transpose, pack, cast bf16."""
    assert E % num_heads == 0
    Dh = E // num_heads
    scale = 1.0 / math.sqrt(Dh)
    w_in = raw["in_proj_weight"]                       # (3E, E)
    b_in = raw["in_proj_bias"]                         # (3E,)
    w_q = w_in[:E] * scale
    b_q = b_in[:E] * scale
    w_qkv = jnp.concatenate([w_q, w_in[E:]], axis=0)   # (3E, E), q rows scaled
    b_qkv = jnp.concatenate([b_q, b_in[E:]], axis=0)
    w_out_t = jnp.transpose(raw["out_proj_weight"])    # (E, E), rows = concat-head dim
    return dict(
        w_qkv_t=jnp.transpose(w_qkv).astype(jnp.bfloat16),      # (E, 3E)
        b_qkv=b_qkv.astype(jnp.float32),
        w_q_t=jnp.transpose(w_q).astype(jnp.bfloat16),          # (E, E)
        b_q=b_q.astype(jnp.float32),
        w_kv_t=jnp.transpose(w_in[E:]).astype(jnp.bfloat16),    # (E, 2E)
        b_kv=b_in[E:].astype(jnp.float32),
        w_out_hm=w_out_t.reshape(num_heads, Dh, E).astype(jnp.bfloat16),
        b_out=raw["out_proj_bias"].astype(jnp.float32),
        ln_weight=raw["ln_weight"],
        ln_bias=raw["ln_bias"],
    )


# ----------------------------------------------------------------------------
# Pure-JAX f32 reference (eval mode) for a numerical sanity check
# ----------------------------------------------------------------------------
def reference_forward(x, y, raw, num_heads, eps=1e-5):
    if y is None:
        y = x
    S, B, E = x.shape
    H = num_heads
    Dh = E // H
    w_in, b_in = raw["in_proj_weight"], raw["in_proj_bias"]
    q = jnp.einsum("sbe,fe->sbf", x, w_in[:E]) + b_in[:E]
    k = jnp.einsum("sbe,fe->sbf", y, w_in[E:2 * E]) + b_in[E:2 * E]
    v = jnp.einsum("sbe,fe->sbf", y, w_in[2 * E:]) + b_in[2 * E:]

    def split(t):
        return t.reshape(t.shape[0], B, H, Dh).transpose(1, 2, 0, 3)

    qh, kh, vh = split(q), split(k), split(v)
    s = jnp.einsum("bhqd,bhkd->bhqk", qh, kh) / math.sqrt(Dh)
    p = jax.nn.softmax(s, axis=-1)
    o = jnp.einsum("bhqk,bhkd->bhqd", p, vh)
    o = o.transpose(2, 0, 1, 3).reshape(S, B, E)
    o = jnp.einsum("sbe,fe->sbf", o, raw["out_proj_weight"]) + raw["out_proj_bias"]
    z = x + o
    mean = z.mean(-1, keepdims=True)
    var = jnp.square(z - mean).mean(-1, keepdims=True)
    return (z - mean) / jnp.sqrt(var + eps) * raw["ln_weight"] + raw["ln_bias"]


if __name__ == "__main__":
    SEQ, SEQ_KV, BATCH, EMBED, HEADS = 8, 16, 2, 128, 4

    key = jax.random.PRNGKey(0)
    kp, kx, ky = jax.random.split(key, 3)
    raw = init_params(kp, EMBED)
    params = prepare_params(raw, EMBED, HEADS)
    x = jax.random.normal(kx, (SEQ, BATCH, EMBED), jnp.float32)
    y = jax.random.normal(ky, (SEQ_KV, BATCH, EMBED), jnp.float32)

    fwd = jax.jit(lambda xi, yi: multi_head_attention_forward(xi, yi, params, HEADS))

    # self-attention path (y=None -> y = x)
    out_self = jax.block_until_ready(fwd(x, None))
    assert out_self.shape == (SEQ, BATCH, EMBED)
    ref_self = reference_forward(x, None, raw, HEADS)
    err_self = float(jnp.max(jnp.abs(out_self - ref_self)))
    # bf16 MXU path vs f32 reference -> slightly relaxed tolerance
    assert err_self < 7e-2, f"self-attention mismatch: {err_self}"

    # cross-attention path (y given)
    out_cross = jax.block_until_ready(fwd(x, y))
    assert out_cross.shape == (SEQ, BATCH, EMBED)
    ref_cross = reference_forward(x, y, raw, HEADS)
    err_cross = float(jnp.max(jnp.abs(out_cross - ref_cross)))
    assert err_cross < 7e-2, f"cross-attention mismatch: {err_cross}"

    print("KERNEL_OK")
</pallas_src>

<mosaic_0001>
module attributes {stable_mosaic.version = 11 : i64} {
  func.func @_linear_kernel(%arg0: i32, %arg1: i32, %arg2: memref<16x128xf32, #tpu.memory_space<vmem>>, %arg3: memref<128x384xbf16, #tpu.memory_space<vmem>>, %arg4: memref<1x384xf32, #tpu.memory_space<vmem>>, %arg5: memref<16x384xbf16, #tpu.memory_space<vmem>>) attributes {dimension_semantics = [#tpu.dimension_semantics<parallel>, #tpu.dimension_semantics<parallel>], iteration_bounds = array<i64: 1, 1>, scalar_prefetch = 0 : i64, scratch_operands = 0 : i64, tpu.core_type = #tpu.core_type<tc>, window_params = [{transform_indices = @transform_0, window_bounds = array<i64: 16, 128>}, {transform_indices = @transform_1, window_bounds = array<i64: 128, 384>}, {transform_indices = @transform_2, window_bounds = array<i64: 1, 384>}, {transform_indices = @transform_3, window_bounds = array<i64: 16, 384>}]} {
    %c0 = arith.constant 0 : index
    %c0_0 = arith.constant 0 : index
    %0 = vector.load %arg2[%c0, %c0_0] : memref<16x128xf32, #tpu.memory_space<vmem>>, vector<16x128xf32>
    %1 = arith.truncf %0 : vector<16x128xf32> to vector<16x128xbf16>
    %c0_1 = arith.constant 0 : index
    %c0_2 = arith.constant 0 : index
    %2 = vector.load %arg3[%c0_1, %c0_2] : memref<128x384xbf16, #tpu.memory_space<vmem>>, vector<128x384xbf16>
    %cst = arith.constant dense<0.000000e+00> : vector<16x384xf32>
    %3 = tpu.matmul %1, %2, %cst {dimension_numbers = #tpu.dot_dimension_numbers<[1], [0], [0], [1], [0, 0, 1, 1], [], []>} : vector<16x128xbf16>, vector<128x384xbf16>, vector<16x384xf32> -> vector<16x384xf32>
    %c0_3 = arith.constant 0 : index
    %c0_4 = arith.constant 0 : index
    %4 = vector.load %arg4[%c0_3, %c0_4] : memref<1x384xf32, #tpu.memory_space<vmem>>, vector<1x384xf32>
    %5 = vector.broadcast %4 : vector<1x384xf32> to vector<16x384xf32>
    %6 = arith.addf %3, %5 : vector<16x384xf32>
    %7 = arith.truncf %6 : vector<16x384xf32> to vector<16x384xbf16>
    %c0_5 = arith.constant 0 : index
    %c0_6 = arith.constant 0 : index
    %8 = vector.load %arg5[%c0_5, %c0_6] : memref<16x384xbf16, #tpu.memory_space<vmem>>, vector<16x384xbf16>
    tpu.vector_store %arg5[%c0_5, %c0_6], %7 {strides = array<i32>} : memref<16x384xbf16, #tpu.memory_space<vmem>>, vector<16x384xbf16>,
    return
  }
  func.func @transform_0(%arg0: i32, %arg1: i32) -> (i32, i32) {
    %c0_i32 = arith.constant 0 : i32
    %c0_i32_0 = arith.constant 0 : i32
    return %arg0, %c0_i32 : i32, i32
  }
  func.func @transform_1(%arg0: i32, %arg1: i32) -> (i32, i32) {
    %c0_i32 = arith.constant 0 : i32
    %c0_i32_0 = arith.constant 0 : i32
    return %c0_i32, %arg1 : i32, i32
  }
  func.func @transform_2(%arg0: i32, %arg1: i32) -> (i32, i32) {
    %c0_i32 = arith.constant 0 : i32
    %c0_i32_0 = arith.constant 0 : i32
    return %c0_i32, %arg1 : i32, i32
  }
  func.func @transform_3(%arg0: i32, %arg1: i32) -> (i32, i32) {
    %c0_i32 = arith.constant 0 : i32
    return %arg0, %arg1 : i32, i32
  }
}

module attributes {stable_mosaic.version = 11 : i64} {
  func.func @_flash_attention_kernel(%arg0: i32, %arg1: i32, %arg2: i32, %arg3: i32, %arg4: memref<1x1x1x8x32xbf16, #tpu.memory_space<vmem>>, %arg5: memref<1x1x1x8x32xbf16, #tpu.memory_space<vmem>>, %arg6: memref<1x1x1x8x32xbf16, #tpu.memory_space<vmem>>, %arg7: memref<1x1x8x32xbf16, #tpu.memory_space<vmem>>, %arg8: memref<8x1xf32, #tpu.memory_space<vmem>>, %arg9: memref<8x1xf32, #tpu.memory_space<vmem>>, %arg10: memref<8x32xf32, #tpu.memory_space<vmem>>) attributes {dimension_semantics = [#tpu.dimension_semantics<parallel>, #tpu.dimension_semantics<parallel>, #tpu.dimension_semantics<parallel>, #tpu.dimension_semantics<arbitrary>], iteration_bounds = array<i64: 2, 4, 1, 1>, scalar_prefetch = 0 : i64, scratch_operands = 3 : i64, tpu.core_type = #tpu.core_type<tc>, window_params = [{transform_indices = @transform_0, window_bounds = array<i64: 1, 1, 1, 8, 32>}, {transform_indices = @transform_1, window_bounds = array<i64: 1, 1, 1, 8, 32>}, {transform_indices = @transform_2, window_bounds = array<i64: 1, 1, 1, 8, 32>}, {transform_indices = @transform_3, window_bounds = array<i64: 1, 1, 8, 32>}]} {
    %c0_i32 = arith.constant 0 : i32
    %0 = arith.cmpi eq, %arg3, %c0_i32 : i32
    %1 = arith.extui %0 : i1 to i32
    %c0_i32_0 = arith.constant 0 : i32
    %2 = arith.cmpi ne, %1, %c0_i32_0 : i32
    scf.if %2 {
      %cst_32 = arith.constant -1.000000e+30 : f32
      %36 = vector.broadcast %cst_32 : f32 to vector<8x1xf32>
      %c0_33 = arith.constant 0 : index
      %c0_34 = arith.constant 0 : index
      %37 = vector.load %arg8[%c0_33, %c0_34] : memref<8x1xf32, #tpu.memory_space<vmem>>, vector<8x1xf32>
      tpu.vector_store %arg8[%c0_33, %c0_34], %36 {strides = array<i32>} : memref<8x1xf32, #tpu.memory_space<vmem>>, vector<8x1xf32>,
      %cst_35 = arith.constant 0.000000e+00 : f32
      %38 = vector.broadcast %cst_35 : f32 to vector<8x1xf32>
      %c0_36 = arith.constant 0 : index
      %c0_37 = arith.constant 0 : index
      %39 = vector.load %arg9[%c0_36, %c0_37] : memref<8x1xf32, #tpu.memory_space<vmem>>, vector<8x1xf32>
      tpu.vector_store %arg9[%c0_36, %c0_37], %38 {strides = array<i32>} : memref<8x1xf32, #tpu.memory_space<vmem>>, vector<8x1xf32>,
      %cst_38 = arith.constant 0.000000e+00 : f32
      %40 = vector.broadcast %cst_38 : f32 to vector<8x32xf32>
      %c0_39 = arith.constant 0 : index
      %c0_40 = arith.constant 0 : index
      %41 = vector.load %arg10[%c0_39, %c0_40] : memref<8x32xf32, #tpu.memory_space<vmem>>, vector<8x32xf32>
      tpu.vector_store %arg10[%c0_39, %c0_40], %40 {strides = array<i32>} : memref<8x32xf32, #tpu.memory_space<vmem>>, vector<8x32xf32>,
    } else {
    }
    %c0 = arith.constant 0 : index
    %c0_1 = arith.constant 0 : index
    %c0_2 = arith.constant 0 : index
    %c0_3 = arith.constant 0 : index
    %c0_4 = arith.constant 0 : index
    %3 = vector.load %arg4[%c0, %c0_1, %c0_2, %c0_3, %c0_4] : memref<1x1x1x8x32xbf16, #tpu.memory_space<vmem>>, vector<1x1x1x8x32xbf16>
    %4 = vector.shape_cast %3 : vector<1x1x1x8x32xbf16> to vector<8x32xbf16>
    %c0_5 = arith.constant 0 : index
    %c0_6 = arith.constant 0 : index
    %c0_7 = arith.constant 0 : index
    %c0_8 = arith.constant 0 : index
    %c0_9 = arith.constant 0 : index
    %5 = vector.load %arg5[%c0_5, %c0_6, %c0_7, %c0_8, %c0_9] : memref<1x1x1x8x32xbf16, #tpu.memory_space<vmem>>, vector<1x1x1x8x32xbf16>
    %6 = vector.shape_cast %5 : vector<1x1x1x8x32xbf16> to vector<8x32xbf16>
    %c0_10 = arith.constant 0 : index
    %c0_11 = arith.constant 0 : index
    %c0_12 = arith.constant 0 : index
    %c0_13 = arith.constant 0 : index
    %c0_14 = arith.constant 0 : index
    %7 = vector.load %arg6[%c0_10, %c0_11, %c0_12, %c0_13, %c0_14] : memref<1x1x1x8x32xbf16, #tpu.memory_space<vmem>>, vector<1x1x1x8x32xbf16>
    %8 = vector.shape_cast %7 : vector<1x1x1x8x32xbf16> to vector<8x32xbf16>
    %cst = arith.constant dense<0.000000e+00> : vector<8x8xf32>
    %9 = tpu.matmul %4, %6, %cst {dimension_numbers = #tpu.dot_dimension_numbers<[1], [1], [0], [0], [0, 0, 1, 0], [], []>} : vector<8x32xbf16>, vector<8x32xbf16>, vector<8x8xf32> -> vector<8x8xf32>
    %c0_15 = arith.constant 0 : index
    %c0_16 = arith.constant 0 : index
    %10 = vector.load %arg8[%c0_15, %c0_16] : memref<8x1xf32, #tpu.memory_space<vmem>>, vector<8x1xf32>
    %cst_17 = arith.constant dense<0xFF800000> : vector<8xf32>
    %11 = vector.multi_reduction <maximumf>, %9, %cst_17 [1] : vector<8x8xf32> to vector<8xf32>
    %12 = vector.shape_cast %11 : vector<8xf32> to vector<8x1xf32>
    %13 = arith.maximumf %10, %12 : vector<8x1xf32>
    %14 = arith.subf %10, %13 : vector<8x1xf32>
    %15 = math.exp %14 : vector<8x1xf32>
    %16 = vector.broadcast %13 : vector<8x1xf32> to vector<8x8xf32>
    %17 = arith.subf %9, %16 : vector<8x8xf32>
    %18 = math.exp %17 : vector<8x8xf32>
    %c0_18 = arith.constant 0 : index
    %c0_19 = arith.constant 0 : index
    %19 = vector.load %arg9[%c0_18, %c0_19] : memref<8x1xf32, #tpu.memory_space<vmem>>, vector<8x1xf32>
    %20 = arith.mulf %15, %19 : vector<8x1xf32>
    %cst_20 = arith.constant dense<0.000000e+00> : vector<8xf32>
    %21 = vector.multi_reduction <add>, %18, %cst_20 [1] : vector<8x8xf32> to vector<8xf32>
    %22 = vector.shape_cast %21 : vector<8xf32> to vector<8x1xf32>
    %23 = arith.addf %20, %22 : vector<8x1xf32>
    %c0_21 = arith.constant 0 : index
    %c0_22 = arith.constant 0 : index
    %24 = vector.load %arg9[%c0_21, %c0_22] : memref<8x1xf32, #tpu.memory_space<vmem>>, vector<8x1xf32>
    tpu.vector_store %arg9[%c0_21, %c0_22], %23 {strides = array<i32>} : memref<8x1xf32, #tpu.memory_space<vmem>>, vector<8x1xf32>,
    %c0_23 = arith.constant 0 : index
    %c0_24 = arith.constant 0 : index
    %25 = vector.load %arg10[%c0_23, %c0_24] : memref<8x32xf32, #tpu.memory_space<vmem>>, vector<8x32xf32>
    %26 = vector.broadcast %15 : vector<8x1xf32> to vector<8x32xf32>
    %27 = arith.mulf %26, %25 : vector<8x32xf32>
    %28 = arith.truncf %18 : vector<8x8xf32> to vector<8x8xbf16>
    %cst_25 = arith.constant dense<0.000000e+00> : vector<8x32xf32>
    %29 = tpu.matmul %28, %8, %cst_25 {dimension_numbers = #tpu.dot_dimension_numbers<[1], [0], [0], [1], [0, 0, 1, 1], [], []>} : vector<8x8xbf16>, vector<8x32xbf16>, vector<8x32xf32> -> vector<8x32xf32>
    %30 = arith.addf %27, %29 : vector<8x32xf32>
    %c0_26 = arith.constant 0 : index
    %c0_27 = arith.constant 0 : index
    %31 = vector.load %arg10[%c0_26, %c0_27] : memref<8x32xf32, #tpu.memory_space<vmem>>, vector<8x32xf32>
    tpu.vector_store %arg10[%c0_26, %c0_27], %30 {strides = array<i32>} : memref<8x32xf32, #tpu.memory_space<vmem>>, vector<8x32xf32>,
    %c0_28 = arith.constant 0 : index
    %c0_29 = arith.constant 0 : index
    %32 = vector.load %arg8[%c0_28, %c0_29] : memref<8x1xf32, #tpu.memory_space<vmem>>, vector<8x1xf32>
    tpu.vector_store %arg8[%c0_28, %c0_29], %13 {strides = array<i32>} : memref<8x1xf32, #tpu.memory_space<vmem>>, vector<8x1xf32>,
    %c0_i32_30 = arith.constant 0 : i32
    %33 = arith.cmpi eq, %arg3, %c0_i32_30 : i32
    %34 = arith.extui %33 : i1 to i32
    %c0_i32_31 = arith.constant 0 : i32
    %35 = arith.cmpi ne, %34, %c0_i32_31 : i32
    scf.if %35 {
      %c0_32 = arith.constant 0 : index
      %c0_33 = arith.constant 0 : index
      %36 = vector.load %arg10[%c0_32, %c0_33] : memref<8x32xf32, #tpu.memory_space<vmem>>, vector<8x32xf32>
      %c0_34 = arith.constant 0 : index
      %c0_35 = arith.constant 0 : index
      %37 = vector.load %arg9[%c0_34, %c0_35] : memref<8x1xf32, #tpu.memory_space<vmem>>, vector<8x1xf32>
      %38 = tpu.reciprocal %37 {approx = true} : vector<8x1xf32> -> vector<8x1xf32>
      %39 = vector.broadcast %38 : vector<8x1xf32> to vector<8x32xf32>
      %40 = arith.mulf %36, %39 : vector<8x32xf32>
      %41 = arith.truncf %40 : vector<8x32xf32> to vector<8x32xbf16>
      %c0_36 = arith.constant 0 : index
      %c0_37 = arith.constant 0 : index
      %c0_38 = arith.constant 0 : index
      %c0_39 = arith.constant 0 : index
      %42 = vector.load %arg7[%c0_36, %c0_37, %c0_38, %c0_39] : memref<1x1x8x32xbf16, #tpu.memory_space<vmem>>, vector<1x1x8x32xbf16>
      %43 = vector.shape_cast %42 : vector<1x1x8x32xbf16> to vector<8x32xbf16>
      %44 = vector.shape_cast %41 : vector<8x32xbf16> to vector<1x1x8x32xbf16>
      tpu.vector_store %arg7[%c0_36, %c0_37, %c0_38, %c0_39], %44 {strides = array<i32>} : memref<1x1x8x32xbf16, #tpu.memory_space<vmem>>, vector<1x1x8x32xbf16>,
    } else {
    }
    return
  }
  func.func @transform_0(%arg0: i32, %arg1: i32, %arg2: i32, %arg3: i32) -> (i32, i32, i32, i32, i32) {
    %c0_i32 = arith.constant 0 : i32
    %c0_i32_0 = arith.constant 0 : i32
    %c0_i32_1 = arith.constant 0 : i32
    return %c0_i32, %arg0, %arg1, %arg2, %c0_i32_0 : i32, i32, i32, i32, i32
  }
  func.func @transform_1(%arg0: i32, %arg1: i32, %arg2: i32, %arg3: i32) -> (i32, i32, i32, i32, i32) {
    %c1_i32 = arith.constant 1 : i32
    %c0_i32 = arith.constant 0 : i32
    %c0_i32_0 = arith.constant 0 : i32
    return %c1_i32, %arg0, %arg1, %arg3, %c0_i32 : i32, i32, i32, i32, i32
  }
  func.func @transform_2(%arg0: i32, %arg1: i32, %arg2: i32, %arg3: i32) -> (i32, i32, i32, i32, i32) {
    %c2_i32 = arith.constant 2 : i32
    %c0_i32 = arith.constant 0 : i32
    %c0_i32_0 = arith.constant 0 : i32
    return %c2_i32, %arg0, %arg1, %arg3, %c0_i32 : i32, i32, i32, i32, i32
  }
  func.func @transform_3(%arg0: i32, %arg1: i32, %arg2: i32, %arg3: i32) -> (i32, i32, i32, i32) {
    %c0_i32 = arith.constant 0 : i32
    %c0_i32_0 = arith.constant 0 : i32
    return %arg0, %arg1, %arg2, %c0_i32 : i32, i32, i32, i32
  }
}

module attributes {stable_mosaic.version = 11 : i64} {
  func.func @_out_norm_kernel(%arg0: i32, %arg1: i32, %arg2: memref<1x4x8x32xbf16, #tpu.memory_space<vmem>>, %arg3: memref<4x32x128xbf16, #tpu.memory_space<vmem>>, %arg4: memref<1x128xf32, #tpu.memory_space<vmem>>, %arg5: memref<1x8x128xf32, #tpu.memory_space<vmem>>, %arg6: memref<1x128xf32, #tpu.memory_space<vmem>>, %arg7: memref<1x128xf32, #tpu.memory_space<vmem>>, %arg8: memref<1x8x128xf32, #tpu.memory_space<vmem>>) attributes {dimension_semantics = [#tpu.dimension_semantics<parallel>, #tpu.dimension_semantics<parallel>], iteration_bounds = array<i64: 2, 1>, scalar_prefetch = 0 : i64, scratch_operands = 0 : i64, tpu.core_type = #tpu.core_type<tc>, window_params = [{transform_indices = @transform_0, window_bounds = array<i64: 1, 4, 8, 32>}, {pipeline_mode = #tpu.pipeline_mode<synchronous>, transform_indices = @transform_1, window_bounds = array<i64: 4, 32, 128>}, {pipeline_mode = #tpu.pipeline_mode<synchronous>, transform_indices = @transform_2, window_bounds = array<i64: 1, 128>}, {transform_indices = @transform_3, window_bounds = array<i64: 1, 8, 128>}, {pipeline_mode = #tpu.pipeline_mode<synchronous>, transform_indices = @transform_4, window_bounds = array<i64: 1, 128>}, {pipeline_mode = #tpu.pipeline_mode<synchronous>, transform_indices = @transform_5, window_bounds = array<i64: 1, 128>}, {transform_indices = @transform_6, window_bounds = array<i64: 1, 8, 128>}]} {
    %c0 = arith.constant 0 : index
    %c0_0 = arith.constant 0 : index
    %c0_1 = arith.constant 0 : index
    %c0_2 = arith.constant 0 : index
    %0 = vector.load %arg2[%c0, %c0_0, %c0_1, %c0_2] : memref<1x4x8x32xbf16, #tpu.memory_space<vmem>>, vector<1x1x8x32xbf16>
    %1 = vector.shape_cast %0 : vector<1x1x8x32xbf16> to vector<8x32xbf16>
    %c0_3 = arith.constant 0 : index
    %c0_4 = arith.constant 0 : index
    %c0_5 = arith.constant 0 : index
    %2 = vector.load %arg3[%c0_3, %c0_4, %c0_5] : memref<4x32x128xbf16, #tpu.memory_space<vmem>>, vector<1x32x128xbf16>
    %3 = vector.shape_cast %2 : vector<1x32x128xbf16> to vector<32x128xbf16>
    %cst = arith.constant dense<0.000000e+00> : vector<8x128xf32>
    %4 = tpu.matmul %1, %3, %cst {dimension_numbers = #tpu.dot_dimension_numbers<[1], [0], [0], [1], [0, 0, 1, 1], [], []>} : vector<8x32xbf16>, vector<32x128xbf16>, vector<8x128xf32> -> vector<8x128xf32>
    %c0_6 = arith.constant 0 : index
    %c1 = arith.constant 1 : index
    %c0_7 = arith.constant 0 : index
    %c0_8 = arith.constant 0 : index
    %5 = vector.load %arg2[%c0_6, %c1, %c0_7, %c0_8] : memref<1x4x8x32xbf16, #tpu.memory_space<vmem>>, vector<1x1x8x32xbf16>
    %6 = vector.shape_cast %5 : vector<1x1x8x32xbf16> to vector<8x32xbf16>
    %c1_9 = arith.constant 1 : index
    %c0_10 = arith.constant 0 : index
    %c0_11 = arith.constant 0 : index
    %7 = vector.load %arg3[%c1_9, %c0_10, %c0_11] : memref<4x32x128xbf16, #tpu.memory_space<vmem>>, vector<1x32x128xbf16>
    %8 = vector.shape_cast %7 : vector<1x32x128xbf16> to vector<32x128xbf16>
    %cst_12 = arith.constant dense<0.000000e+00> : vector<8x128xf32>
    %9 = tpu.matmul %6, %8, %cst_12 {dimension_numbers = #tpu.dot_dimension_numbers<[1], [0], [0], [1], [0, 0, 1, 1], [], []>} : vector<8x32xbf16>, vector<32x128xbf16>, vector<8x128xf32> -> vector<8x128xf32>
    %10 = arith.addf %4, %9 : vector<8x128xf32>
    %c0_13 = arith.constant 0 : index
    %c2 = arith.constant 2 : index
    %c0_14 = arith.constant 0 : index
    %c0_15 = arith.constant 0 : index
    %11 = vector.load %arg2[%c0_13, %c2, %c0_14, %c0_15] : memref<1x4x8x32xbf16, #tpu.memory_space<vmem>>, vector<1x1x8x32xbf16>
    %12 = vector.shape_cast %11 : vector<1x1x8x32xbf16> to vector<8x32xbf16>
    %c2_16 = arith.constant 2 : index
    %c0_17 = arith.constant 0 : index
    %c0_18 = arith.constant 0 : index
    %13 = vector.load %arg3[%c2_16, %c0_17, %c0_18] : memref<4x32x128xbf16, #tpu.memory_space<vmem>>, vector<1x32x128xbf16>
    %14 = vector.shape_cast %13 : vector<1x32x128xbf16> to vector<32x128xbf16>
    %cst_19 = arith.constant dense<0.000000e+00> : vector<8x128xf32>
    %15 = tpu.matmul %12, %14, %cst_19 {dimension_numbers = #tpu.dot_dimension_numbers<[1], [0], [0], [1], [0, 0, 1, 1], [], []>} : vector<8x32xbf16>, vector<32x128xbf16>, vector<8x128xf32> -> vector<8x128xf32>
    %16 = arith.addf %10, %15 : vector<8x128xf32>
    %c0_20 = arith.constant 0 : index
    %c3 = arith.constant 3 : index
    %c0_21 = arith.constant 0 : index
    %c0_22 = arith.constant 0 : index
    %17 = vector.load %arg2[%c0_20, %c3, %c0_21, %c0_22] : memref<1x4x8x32xbf16, #tpu.memory_space<vmem>>, vector<1x1x8x32xbf16>
    %18 = vector.shape_cast %17 : vector<1x1x8x32xbf16> to vector<8x32xbf16>
    %c3_23 = arith.constant 3 : index
    %c0_24 = arith.constant 0 : index
    %c0_25 = arith.constant 0 : index
    %19 = vector.load %arg3[%c3_23, %c0_24, %c0_25] : memref<4x32x128xbf16, #tpu.memory_space<vmem>>, vector<1x32x128xbf16>
    %20 = vector.shape_cast %19 : vector<1x32x128xbf16> to vector<32x128xbf16>
    %cst_26 = arith.constant dense<0.000000e+00> : vector<8x128xf32>
    %21 = tpu.matmul %18, %20, %cst_26 {dimension_numbers = #tpu.dot_dimension_numbers<[1], [0], [0], [1], [0, 0, 1, 1], [], []>} : vector<8x32xbf16>, vector<32x128xbf16>, vector<8x128xf32> -> vector<8x128xf32>
    %22 = arith.addf %16, %21 : vector<8x128xf32>
    %c0_27 = arith.constant 0 : index
    %c0_28 = arith.constant 0 : index
    %c0_29 = arith.constant 0 : index
    %23 = vector.load %arg5[%c0_27, %c0_28, %c0_29] : memref<1x8x128xf32, #tpu.memory_space<vmem>>, vector<1x8x128xf32>
    %24 = vector.shape_cast %23 : vector<1x8x128xf32> to vector<8x128xf32>
    %25 = arith.addf %24, %22 : vector<8x128xf32>
    %c0_30 = arith.constant 0 : index
    %c0_31 = arith.constant 0 : index
    %26 = vector.load %arg4[%c0_30, %c0_31] : memref<1x128xf32, #tpu.memory_space<vmem>>, vector<1x128xf32>
    %27 = vector.broadcast %26 : vector<1x128xf32> to vector<8x128xf32>
    %28 = arith.addf %25, %27 : vector<8x128xf32>
    %cst_32 = arith.constant dense<0.000000e+00> : vector<8xf32>
    %29 = vector.multi_reduction <add>, %28, %cst_32 [1] : vector<8x128xf32> to vector<8xf32>
    %30 = vector.shape_cast %29 : vector<8xf32> to vector<8x1xf32>
    %cst_33 = arith.constant 1.280000e+02 : f32
    %31 = vector.broadcast %cst_33 : f32 to vector<8x1xf32>
    %32 = arith.divf %30, %31 : vector<8x1xf32>
    %33 = vector.broadcast %32 : vector<8x1xf32> to vector<8x128xf32>
    %34 = arith.subf %28, %33 : vector<8x128xf32>
    %35 = arith.mulf %34, %34 : vector<8x128xf32>
    %cst_34 = arith.constant dense<0.000000e+00> : vector<8xf32>
    %36 = vector.multi_reduction <add>, %35, %cst_34 [1] : vector<8x128xf32> to vector<8xf32>
    %37 = vector.shape_cast %36 : vector<8xf32> to vector<8x1xf32>
    %cst_35 = arith.constant 1.280000e+02 : f32
    %38 = vector.broadcast %cst_35 : f32 to vector<8x1xf32>
    %39 = arith.divf %37, %38 : vector<8x1xf32>
    %40 = vector.broadcast %32 : vector<8x1xf32> to vector<8x128xf32>
    %41 = arith.subf %28, %40 : vector<8x128xf32>
    %cst_36 = arith.constant 9.99999974E-6 : f32
    %42 = vector.broadcast %cst_36 : f32 to vector<8x1xf32>
    %43 = arith.addf %39, %42 : vector<8x1xf32>
    %44 = math.rsqrt %43 : vector<8x1xf32>
    %45 = vector.broadcast %44 : vector<8x1xf32> to vector<8x128xf32>
    %46 = arith.mulf %41, %45 : vector<8x128xf32>
    %c0_37 = arith.constant 0 : index
    %c0_38 = arith.constant 0 : index
    %47 = vector.load %arg6[%c0_37, %c0_38] : memref<1x128xf32, #tpu.memory_space<vmem>>, vector<1x128xf32>
    %48 = vector.broadcast %47 : vector<1x128xf32> to vector<8x128xf32>
    %49 = arith.mulf %46, %48 : vector<8x128xf32>
    %c0_39 = arith.constant 0 : index
    %c0_40 = arith.constant 0 : index
    %50 = vector.load %arg7[%c0_39, %c0_40] : memref<1x128xf32, #tpu.memory_space<vmem>>, vector<1x128xf32>
    %51 = vector.broadcast %50 : vector<1x128xf32> to vector<8x128xf32>
    %52 = arith.addf %49, %51 : vector<8x128xf32>
    %c0_41 = arith.constant 0 : index
    %c0_42 = arith.constant 0 : index
    %c0_43 = arith.constant 0 : index
    %53 = vector.load %arg8[%c0_41, %c0_42, %c0_43] : memref<1x8x128xf32, #tpu.memory_space<vmem>>, vector<1x8x128xf32>
    %54 = vector.shape_cast %53 : vector<1x8x128xf32> to vector<8x128xf32>
    %55 = vector.shape_cast %52 : vector<8x128xf32> to vector<1x8x128xf32>
    tpu.vector_store %arg8[%c0_41, %c0_42, %c0_43], %55 {strides = array<i32>} : memref<1x8x128xf32, #tpu.memory_space<vmem>>, vector<1x8x128xf32>,
    return
  }
  func.func @transform_0(%arg0: i32, %arg1: i32) -> (i32, i32, i32, i32) {
    %c0_i32 = arith.constant 0 : i32
    %c0_i32_0 = arith.constant 0 : i32
    %c0_i32_1 = arith.constant 0 : i32
    return %arg0, %c0_i32, %arg1, %c0_i32_0 : i32, i32, i32, i32
  }
  func.func @transform_1(%arg0: i32, %arg1: i32) -> (i32, i32, i32) {
    %c0_i32 = arith.constant 0 : i32
    %c0_i32_0 = arith.constant 0 : i32
    %c0_i32_1 = arith.constant 0 : i32
    %c0_i32_2 = arith.constant 0 : i32
    return %c0_i32, %c0_i32_0, %c0_i32_1 : i32, i32, i32
  }
  func.func @transform_2(%arg0: i32, %arg1: i32) -> (i32, i32) {
    %c0_i32 = arith.constant 0 : i32
    %c0_i32_0 = arith.constant 0 : i32
    %c0_i32_1 = arith.constant 0 : i32
    return %c0_i32, %c0_i32_0 : i32, i32
  }
  func.func @transform_3(%arg0: i32, %arg1: i32) -> (i32, i32, i32) {
    %c0_i32 = arith.constant 0 : i32
    %c0_i32_0 = arith.constant 0 : i32
    return %arg0, %arg1, %c0_i32 : i32, i32, i32
  }
  func.func @transform_4(%arg0: i32, %arg1: i32) -> (i32, i32) {
    %c0_i32 = arith.constant 0 : i32
    %c0_i32_0 = arith.constant 0 : i32
    %c0_i32_1 = arith.constant 0 : i32
    return %c0_i32, %c0_i32_0 : i32, i32
  }
  func.func @transform_5(%arg0: i32, %arg1: i32) -> (i32, i32) {
    %c0_i32 = arith.constant 0 : i32
    %c0_i32_0 = arith.constant 0 : i32
    %c0_i32_1 = arith.constant 0 : i32
    return %c0_i32, %c0_i32_0 : i32, i32
  }
  func.func @transform_6(%arg0: i32, %arg1: i32) -> (i32, i32, i32) {
    %c0_i32 = arith.constant 0 : i32
    %c0_i32_0 = arith.constant 0 : i32
    return %arg0, %arg1, %c0_i32 : i32, i32, i32
  }
}

</mosaic_0001>

<bundles_post_ra>
// kernel: _lambda_.3
= control target key start
LH: loop header
LB: loop body
LE: loop exit
PB: predicated region body
PF: predicated region fallthrough
CT: control target
= control target key end

     0   :  { %v403_v0 = vmov 0.0   ;;  %vm404_vm0 = vmmov 0   ;;  %v405_v3 = vmov 0   ;;  %v52_v29 = vlaneseq  ;;  %s519_s1 = inlined_call_operand.vmem [shape: bf16[128,384], index: 1, kind: input, shape index: {}]   ;;  %s520_s0 = inlined_call_operand.vmem [shape: f32[16,128], index: 0, kind: input, shape index: {}]   ;;  %s521_s2 = inlined_call_operand.vmem [shape: f32[1,384], index: 2, kind: input, shape index: {}]   ;;  %s522_s3 = inlined_call_operand.vmem [shape: bf16[16,384], index: 3, kind: output, shape index: {}]  }
   0x1   :  { %348 = vmatprep.subr.bf16.mxu1 %v403_v0  ;;  %v371_v1 = vld [vmem:[%s519_s1 + $0x4] ss:$12 sps:$4 sm:$0xff]   ;;  %364 = vmatprep.mubr.msk.bf16.mxu1 %vm404_vm0, %v403_v0  ;;  %v373_v2 = vld [vmem:[%s519_s1 + $0x8] ss:$12 sps:$4 sm:$0xff]   ;;  %v374_v4 = vld [vmem:[%s519_s1] ss:$12 sps:$4 sm:$0xff]  }
   0x2   :  { %227 = vmatprep.mubr.bf16.mxu0 %v405_v3  ;;  %195 = vmatprep.subr.bf16.mxu0 %v371_v1  ;;  %v375_v5 = vld [vmem:[%s519_s1 + $0x1c] ss:$12 sps:$4 sm:$0xff]   ;;  %v377_v6 = vld [vmem:[%s519_s1 + $0x20] ss:$12 sps:$4 sm:$0xff]   ;;  %v378_v7 = vld [vmem:[%s519_s1 + $0x18] ss:$12 sps:$4 sm:$0xff]  }
   0x3   :  { %349 = vmatpush3.bf16.msra.mxu1 %v373_v2  ;;  %196 = vmatpush1.bf16.msra.mxu0 %v374_v4  ;;  %v379_v8 = vld [vmem:[%s519_s1 + $0x34] ss:$12 sps:$4 sm:$0xff]   ;;  %v381_v9 = vld [vmem:[%s519_s1 + $0x38] ss:$12 sps:$4 sm:$0xff]   ;;  %v382_v10 = vld [vmem:[%s519_s1 + $0x30] ss:$12 sps:$4 sm:$0xff]  }
   0x4   :  { %350 = vmatprep.subr.bf16.mxu1 %v403_v0  ;;  %197 = vmatprep.subr.bf16.mxu0 %v375_v5  ;;  %v383_v11 = vld [vmem:[%s519_s1 + $0x4c] ss:$12 sps:$4 sm:$0xff]   ;;  %v385_v12 = vld [vmem:[%s519_s1 + $0x50] ss:$12 sps:$4 sm:$0xff]   ;;  %v386_v13 = vld [vmem:[%s519_s1 + $0x48] ss:$12 sps:$4 sm:$0xff]  }
   0x5   :  { %v387_v14 = vld [vmem:[%s519_s1 + $0x64] ss:$12 sps:$4 sm:$0xff]   ;;  %v389_v15 = vld [vmem:[%s519_s1 + $0x68] ss:$12 sps:$4 sm:$0xff]   ;;  %v390_v16 = vld [vmem:[%s519_s1 + $0x60] ss:$12 sps:$4 sm:$0xff]  }
   0x6   :  { %v391_v17 = vld [vmem:[%s519_s1 + $0x7c] ss:$12 sps:$4 sm:$0xff]   ;;  %v393_v18 = vld [vmem:[%s519_s1 + $0x80] ss:$12 sps:$4 sm:$0xff]   ;;  %v394_v19 = vld [vmem:[%s519_s1 + $0x78] ss:$12 sps:$4 sm:$0xff]  }
   0x7   :  { %351 = vmatpush3.bf16.msra.mxu1 %v377_v6  ;;  %198 = vmatpush1.bf16.msra.mxu0 %v378_v7  ;;  %v395_v20 = vld [vmem:[%s519_s1 + $0x94] ss:$12 sps:$4 sm:$0xff]   ;;  %v397_v21 = vld [vmem:[%s519_s1 + $0x98] ss:$12 sps:$4 sm:$0xff]   ;;  %v398_v22 = vld [vmem:[%s519_s1 + $0x90] ss:$12 sps:$4 sm:$0xff]  }
   0x8   :  { %352 = vmatprep.subr.bf16.mxu1 %v403_v0  ;;  %199 = vmatprep.subr.bf16.mxu0 %v379_v8  ;;  %v399_v23 = vld [vmem:[%s519_s1 + $0xac] ss:$12 sps:$4 sm:$0xff]   ;;  %v401_v24 = vld [vmem:[%s519_s1 + $0xb0] ss:$12 sps:$4 sm:$0xff]   ;;  %v15_v25 = vld [vmem:[%s520_s0] sm:$0xff]  ;;  %v53_v30 = vshrl.u32 %v52_v29, 7 }
   0x9   :  { %v16_v26 = vld [vmem:[%s520_s0 + $0x8] sm:$0xff]  ;;  %v50_v32 = vld [vmem:[%s521_s2] sm:$0x7] }
   0xa   :  { %v402_v27 = vld [vmem:[%s519_s1 + $0xa8] ss:$12 sps:$4 sm:$0xff]   ;;  %v17_v28 = vpack.c.bf16 %v16_v26, %v15_v25  ;;  %v62_v31 = vsub.s32 2, %v53_v30  ;;  %v54_v33 = vsub.s32 0, %v53_v30  ;;  %v58_v34 = vsub.s32 1, %v53_v30 }
   0xb   :  { %353 = vmatpush3.bf16.msra.mxu1 %v381_v9  ;;  %200 = vmatpush1.bf16.msra.mxu0 %v382_v10 }
   0xc   :  { %354 = vmatprep.subr.bf16.mxu1 %v403_v0  ;;  %201 = vmatprep.subr.bf16.mxu0 %v383_v11  ;;  %v63_v35 = vrot.slane %v50_v32, %v62_v31  ;;  %v55_v36 = vrot.slane %v50_v32, %v54_v33  ;;  %v59_v37 = vrot.slane %v50_v32, %v58_v34 }
   0xf   :  { %355 = vmatpush3.bf16.msra.mxu1 %v385_v12  ;;  %202 = vmatpush1.bf16.msra.mxu0 %v386_v13 }
  0x10   :  { %356 = vmatprep.subr.bf16.mxu1 %v403_v0  ;;  %203 = vmatprep.subr.bf16.mxu0 %v387_v14 }
  0x13   :  { %357 = vmatpush3.bf16.msra.mxu1 %v389_v15  ;;  %204 = vmatpush1.bf16.msra.mxu0 %v390_v16 }
  0x14   :  { %358 = vmatprep.subr.bf16.mxu1 %v403_v0  ;;  %205 = vmatprep.subr.bf16.mxu0 %v391_v17 }
  0x17   :  { %359 = vmatpush3.bf16.msra.mxu1 %v393_v18  ;;  %206 = vmatpush1.bf16.msra.mxu0 %v394_v19 }
  0x18   :  { %360 = vmatprep.subr.bf16.mxu1 %v403_v0  ;;  %207 = vmatprep.subr.bf16.mxu0 %v395_v20 }
  0x1b   :  { %361 = vmatpush3.bf16.msra.mxu1 %v397_v21  ;;  %208 = vmatpush1.bf16.msra.mxu0 %v398_v22 }
  0x1c   :  { %362 = vmatprep.subr.bf16.mxu1 %v403_v0  ;;  %209 = vmatprep.subr.bf16.mxu0 %v399_v23 }
  0x1f   :  { %363 = vmatpush3.bf16.msra.mxu1 %v401_v24  ;;  %210 = vmatpush1.bf16.msra.mxu0 %v402_v27 }
  0x22   :  { %365 = vmatmul.mubr.bf16.vlgmr.msra.gmra.mrb[0].mxu1 %v17_v28  ;;  %228 = vmatmul.mubr.bf16.vlgmr.msra.gmra.mrb[0].mxu0 %v17_v28 }
  0xf5   :  { %v272_v38 = vpop.f32.mrb[0].mxu1  ;;  %v229_v40 = vpop.f32.mrb[0].mxu0 }
  0xf6   :  { %v273_v39 = vadd.f32 %v272_v38, %v63_v35  ;;  %v366_v41 = vpop.f32.mrb[1].mxu1  ;;  %v230_v42 = vadd.f32 %v229_v40, %v55_v36  ;;  %v231_v43 = vpop.f32.mrb[1].mxu0 }
  0xf7   :  { %v275_v44 = vpop.f32.mrb[2].mxu1  ;;  %v232_v46 = vadd.f32 %v231_v43, %v59_v37  ;;  %v233_v48 = vpop.f32.mrb[2].mxu0 }
  0xf8   :  { %v336_v45 = vpack.c.bf16 %v273_v39, %v273_v39  ;;  %v276_v47 = vadd.f32 %v275_v44, %v63_v35  ;;  %v367_v49 = vpop.f32.mrb[3].mxu1  ;;  %v234_v50 = vadd.f32 %v233_v48, %v55_v36  ;;  %v235_v51 = vpop.f32.mrb[3].mxu0 }
  0xf9   :  { %v335_v52 = vpack.c.bf16 %v232_v46, %v230_v42  ;;  %v236_v54 = vadd.f32 %v235_v51, %v59_v37 }
  0xfa   :  { %300 = vst [vmem:[%s522_s3 + $0x8] sm:$0xf] %v336_v45  ;;  %v338_v53 = vpack.c.bf16 %v276_v47, %v276_v47 }
  0xfb   :  { %299 = vst [vmem:[%s522_s3] sm:$0xff] %v335_v52  ;;  %v337_v55 = vpack.c.bf16 %v236_v54, %v234_v50 }
  0xfc   :  { %302 = vst [vmem:[%s522_s3 + $0x14] sm:$0xf] %v338_v53 }
  0xfd   :  { %301 = vst [vmem:[%s522_s3 + $0xc] sm:$0xff] %v337_v55 }

// kernel: _lambda_.4
= control target key start
LH: loop header
LB: loop body
LE: loop exit
PB: predicated region body
PF: predicated region fallthrough
CT: control target
= control target key end

     0   :  { %s787_s12 = smov 0   ;;  %s789_s13 = smov 0   ;;  %s861_s0 = inlined_call_operand.vmem [shape: bf16[3,2,4,8,32], index: 0, kind: input, shape index: {}, may-alias: {0,1,2}]   ;;  %s862_s1 = inlined_call_operand.vmem [shape: bf16[3,2,4,8,32], index: 1, kind: input, shape index: {}, may-alias: {0,1,2}]   ;;  %s863_s2 = inlined_call_operand.vmem [shape: bf16[3,2,4,8,32], index: 2, kind: input, shape index: {}, may-alias: {0,1,2}]   ;;  %s864_s3 = inlined_call_operand.vmem [shape: bf16[2,4,8,32], index: 3, kind: output, shape index: {}]  }
   0x1   :  { %s791_s14 = smov 0   ;;  %s793_s15 = smov 0  }
   0x2   :  { %s795_s16 = smov 0  }
   0x3 LB: > { %s35_s17 = sadd.s32 1, %s753_s14  ;;  %s39_s18 = sadd.s32 1, %s757_s15  ;;  %s761_s16 = sphi %s795_s16, %s13_s16   ;;  %s757_s15 = sphi %s793_s15, %s868_s15   ;;  %s753_s14 = sphi %s791_s14, %s867_s14   ;;  %s749_s13 = sphi %s789_s13, %s866_s13   ;;  %s745_s12 = sphi %s787_s12, %s865_s12  }
   0x4   : > { %p37_p0 = scmp.ge.s32.totalorder %s35_s17, 4  ;;  %p640_p1 = scmp.ge.s32.totalorder %s761_s16, 1 }
   0x5   : > { %p219_p2 = scmp.lt.s32.totalorder %s761_s16, 9 }
   0x6   : > { %s870_s17 = smov (%p37_p0, %s35_s17), 0  ;;  %s872_s18 = smov (!%p37_p0, %s39_s18), %s757_s15 }
   0x7   : > { %p220_p3 = pnand %p640_p1, %p219_p2  ;;  %p41_p4 = scmp.ge.s32.totalorder %s872_s18, 2 }
   0x8   : > { %p279_p5 = scmp.lt.s32.totalorder (!%p220_p3), %s749_s13, 1  ;;  %p281_p6 = scmp.lt.s32.totalorder (!%p220_p3), %s745_s12, 3  ;;  %vm333_vm0 = vcmask (!%p220_p3), 261120   ;;  %v763_v0 = vmov (!%p220_p3), 0.0   ;;  %vm764_vm1 = vmmov (!%p220_p3), 0   ;;  %vm330_vm2 = vcmask (!%p220_p3), 7168  }
   0x9   : > { %s874_s18 = smov (%p41_p4, %s872_s18), 0  ;;  %223 = sbr.rel (%p220_p3) target bundleno = 827 (0x33b), region = 32 }
   0xa   : > { %659 = vmatprep.subr.bf16.mxu0 (!%p220_p3), %v763_v0  ;;  %334 = vst.msk [vmem:[#allocation4] sm:$0xff] (!%p220_p3), %vm333_vm0, %v763_v0  ;;  %661 = vmatprep.mubr.msk.bf16.mxu0 (!%p220_p3), %vm764_vm1, %v763_v0  ;;  %v765_v4 = vmov (!%p220_p3), -1e+30   ;;  %vm386_vm3 = vcmask (!%p220_p3), 64512   ;;  %v766_v10 = vmov (!%p220_p3), 0   ;;  %vm421_vm4 = vcmask (!%p220_p3), 1043456  }
   0xb   : > { %665 = vmatprep.subr.bf16.mxu1 (!%p220_p3), %v763_v0  ;;  %667 = vmatprep.mubr.msk.bf16.mxu1 (!%p220_p3), %vm764_vm1, %v763_v0  ;;  %331 = vst.msk [vmem:[#allocation2] sm:$0xff] (!%p220_p3), %vm330_vm2, %v765_v4  ;;  %332 = vst.msk [vmem:[#allocation3] sm:$0xff] (!%p220_p3), %vm330_vm2, %v763_v0  ;;  %vm481_vm5 = vcmask (!%p220_p3), 257024  }
   0xc   : > { %715 = vset.pattern.permute.xlu0 (!%p220_p3), %v766_v10  ;;  %716 = vset.pattern.permute.xlu1 (!%p220_p3), %v766_v10 }
  0x10   : > { %s876_s13 = smov (!%p279_p5, %s749_s13), 1  ;;  %s878_s12 = smov (!%p281_p6, %s745_s12), 3 }
  0x11   : > { %s641_s19 = sshll.u32 %s876_s13, 2  ;;  %v410_v31 = vld [vmem:[#allocation4] sm:$0xff] }
  0x12   : > { %s287_s20 = sadd.s32 %s641_s19, %s878_s12  ;;  %v385_v11 = vld [vmem:[#allocation2] sm:$0xff]  ;;  %v402_v25 = vld [vmem:[#allocation3] sm:$0xff] }
  0x13   : > { %s818_s21 = sshll.u32 %s287_s20, 2 }
  0x14   : > { %s564_s24 = scalar_lea.vmem %s862_s1, %s818_s21  ;;  %s289_s27 = scalar_lea.vmem %s861_s0, %s818_s21 }
  0x15   : > { %v649_v1 = vld [vmem:[%s564_s24 + $0x20] sm:$0xf]  ;;  %s570_s30 = scalar_lea.vmem %s863_s2, %s818_s21  ;;  %s324_s6 = scalar_lea.vmem %s864_s3, %s818_s21 }
  0x16   : > { %v343_v2 = vsel %vm333_vm0, %v649_v1, 0  ;;  %v335_v3 = vld [vmem:[%s289_s27] sm:$0xf] }
  0x17   : > { %660 = vmatpush3.bf16.xpose.msra.mxu0 %v343_v2  ;;  %v650_v15 = vld [vmem:[%s570_s30 + $0x40] sm:$0xf] }
  0x18   : > { %v423_v16 = vsel %vm421_vm4, %v650_v15, 0 }
  0x19   : > { %666 = vmatpush3.bf16.msra.mxu1 %v423_v16 }
  0x1e   : > { %662 = vmatmul.mubr.msk.bf16.vlgmr.msra.gmra.mrb[0].mxu0 %vm333_vm0, %v335_v3 }
  0xf1   : > { %v379_v5 = vpop.f32.mrb[0].mxu0 }
  0xf2   : > { %v663_v6 = vpop.f32.mrb[1].mxu0  ;;  %v387_v7 = vsel %vm386_vm3, %v379_v5, -inf }
  0xf3   : > { %388 = vmax.xlane.f32.xlu0 %v387_v7  ;;  %v382_v8 = vpop.f32.mrb[2].mxu0 }
  0xf4   : > { %v664_v9 = vpop.f32.mrb[3].mxu0 }
 0x180   : > { %v389_v12 = vpop.xlane.xlu0 %388 }
 0x181   : > { %v390_v13 = vmax.f32 %v385_v11, %v389_v12 }
 0x183   : > { %v391_v14 = vsub.f32 %v385_v11, %v390_v13  ;;  %467 = vst.msk [vmem:[#allocation2] sm:$0xff] %vm330_vm2, %v390_v13  ;;  %396 = vperm.xlu0 %715, %v390_v13  }
 0x185   : > { %v392_v23 = vmul.f32 1.442695, %v391_v14 }
 0x202   : > { %v397_v17 = vpop.permute.xlu0 %396 }
 0x203   : > { %v399_v18 = vsub.f32 %v379_v5, %v397_v17 }
 0x205   : > { %v400_v19 = vmul.f32 1.442695, %v399_v18 }
 0x207   : > { %717 = vpow2.f32 %v400_v19 }
 0x208   : > { %719 = vpow2.f32 %v392_v23 }
 0x211   : > { %v718_v20 = vpop.eup %717 }
 0x212   : > { %v404_v21 = vsel %vm386_vm3, %v718_v20, 0.0  ;;  %v417_v22 = vpack.c.bf16 %v718_v20, %v718_v20  ;;  %v720_v24 = vpop.eup %719 }
 0x213   : > { %405 = vadd.xlane.f32.xlu1 %v404_v21  ;;  %v403_v26 = vmul.f32 %v720_v24, %v402_v25 }
 0x214   : > { %668 = vmatmul.mubr.msk.bf16.vlgmr.msra.gmra.mrb[0].mxu1 %vm386_vm3, %v417_v22 }
 0x224   : > { %413 = vperm.xlu1 %716, %v720_v24  }
 0x2a0   : > { %v406_v27 = vpop.xlane.xlu1 %405 }
 0x2a1   : > { %v407_v28 = vadd.f32 %v406_v27, %v403_v26 }
 0x2a3   : > { %409 = vst.msk [vmem:[#allocation3] sm:$0xff] %vm330_vm2, %v407_v28 }
 0x2a4   : > { %v414_v32 = vpop.permute.xlu1 %413 }
 0x2a5   : > { %v416_v33 = vmul.f32 %v414_v32, %v410_v31 }
 0x2aa   : > { %v472_v29 = vld [vmem:[#allocation3] sm:$0xff] }
 0x2ab   : > { %721 = vrcp.f32 %v472_v29 }
 0x2b5   : > { %v722_v30 = vpop.eup %721 }
 0x2b6   : > { %476 = vperm.xlu1 %716, %v722_v30  }
 0x2e7   : > { %v459_v34 = vpop.f32.mrb[0].mxu1 }
 0x2e8   : > { %v465_v35 = vadd.f32 %v459_v34, %v416_v33  ;;  %v669_v36 = vpop.f32.mrb[1].mxu1 }
 0x2e9   : > { %v462_v37 = vpop.f32.mrb[2].mxu1 }
 0x2ea   : > { %466 = vst.msk [vmem:[#allocation4] sm:$0xff] %vm333_vm0, %v465_v35  ;;  %v670_v38 = vpop.f32.mrb[3].mxu1 }
 0x2f1   : > { %v471_v39 = vld [vmem:[#allocation4] sm:$0xff] }
 0x335   : > { %v477_v40 = vpop.permute.xlu1 %476 }
 0x336   : > { %v479_v41 = vmul.f32 %v477_v40, %v471_v39 }
 0x338   : > { %v480_v42 = vpack.c.bf16 %v479_v41, %v479_v41 }
 0x33a   : > { %482 = vst.msk [vmem:[%s324_s6] sm:$0xf] %vm481_vm5, %v480_v42 }
 0x33b PF: > { %s13_s16 = sadd.s32 1, %s761_s16   ;;  %s865_s12 = smov %s753_s14 }
 0x33c   : > { %p10_p7 = scmp.ge.s32.totalorder %s13_s16, 10   ;;  %s866_s13 = smov %s757_s15 }
 0x33d   : > { %s867_s14 = smov %s870_s17  ;;  %s868_s15 = smov %s874_s18 }
 0x33e   :  { %12 = sbr.rel (!%p10_p7) target bundleno = 3 (0x3), region = 76 }

// kernel: _lambda_.5
= control target key start
LH: loop header
LB: loop body
LE: loop exit
PB: predicated region body
PF: predicated region fallthrough
CT: control target
= control target key end

     0   :  { %s873_s21 = smov 0   ;;  %s875_s22 = smov 0   ;;  %s958_s0 = inlined_call_operand.vmem [shape: bf16[2,4,8,32], index: 0, kind: input, shape index: {}]   ;;  %s959_s1 = inlined_call_operand.vmem [shape: bf16[4,32,128], index: 1, kind: input, shape index: {}]   ;;  %s960_s2 = inlined_call_operand.vmem [shape: f32[1,128], index: 2, kind: input, shape index: {}]   ;;  %s961_s3 = inlined_call_operand.vmem [shape: f32[2,8,128], index: 3, kind: input, shape index: {}]   ;;  %s962_s4 = inlined_call_operand.vmem [shape: f32[1,128], index: 4, kind: input, shape index: {}]   ;;  %s963_s5 = inlined_call_operand.vmem [shape: f32[1,128], index: 5, kind: input, shape index: {}]   ;;  %s964_s6 = inlined_call_operand.vmem [shape: f32[2,8,128], index: 6, kind: output, shape index: {}]  }
   0x1   :  { %s877_s23 = smov 0  }
   0x2 LB: > { %s28_s24 = sadd.s32 1, %s830_s22  ;;  %p694_p0 = scmp.ge.s32.totalorder %s834_s23, 1  ;;  %s834_s23 = sphi %s877_s23, %s16_s23   ;;  %s830_s22 = sphi %s875_s22, %s966_s22   ;;  %s826_s21 = sphi %s873_s21, %s965_s21  }
   0x3   : > { %p30_p1 = scmp.ge.s32.totalorder %s28_s24, 2  ;;  %p245_p2 = scmp.lt.s32.totalorder %s834_s23, 3 }
   0x5   : > { %s968_s24 = smov (%p30_p1, %s28_s24), 0  ;;  %p246_p3 = pnand %p694_p0, %p245_p2 }
   0x6   : > { %v802_v0 = vld [vmem:[%s959_s1 + $0x10] sm:$0xff] (!%p246_p3)   ;;  %v836_v1 = vmov (!%p246_p3), 0.0   ;;  %v803_v2 = vld [vmem:[%s959_s1] sm:$0xff] (!%p246_p3)   ;;  %v804_v3 = vld [vmem:[%s959_s1 + $0x18] sm:$0xff] (!%p246_p3)   ;;  %vm837_vm0 = vmmov (!%p246_p3), 0   ;;  %p287_p4 = scmp.lt.s32.totalorder (!%p246_p3), %s826_s21, 1 }
   0x7   : > { %249 = sbr.rel (%p246_p3) target bundleno = 558 (0x22e), region = 44  ;;  %744 = vmatprep.subr.bf16.mxu0 (!%p246_p3), %v836_v1  ;;  %752 = vmatprep.subr.bf16.mxu1 (!%p246_p3), %v836_v1  ;;  %v805_v4 = vld [vmem:[%s959_s1 + $0x8] sm:$0xff] (!%p246_p3)   ;;  %vm334_vm1 = vcmask (!%p246_p3), 261120   ;;  %v806_v5 = vld [vmem:[%s959_s1 + $0x20] sm:$0xff] (!%p246_p3)   ;;  %v807_v6 = vld [vmem:[%s959_s1 + $0x30] sm:$0xff] (!%p246_p3)  }
   0x8   : > { %745 = vmatpush3.bf16.msra.mxu0 (!%p246_p3), %v802_v0  ;;  %748 = vmatprep.mubr.msk.bf16.mxu0 (!%p246_p3), %vm837_vm0, %v836_v1  ;;  %v808_v9 = vld [vmem:[%s959_s1 + $0x28] sm:$0xff] (!%p246_p3)   ;;  %v809_v10 = vld [vmem:[%s959_s1 + $0x38] sm:$0xff] (!%p246_p3)   ;;  %v726_v33 = vld [vmem:[%s960_s2] ss:$0 sm:$0xff] (!%p246_p3) }
   0x9   : > { %753 = vmatpush3.bf16.msra.mxu1 (!%p246_p3), %v803_v2  ;;  %746 = vmatprep.subr.bf16.mxu0 (!%p246_p3), %v836_v1  ;;  %v727_v44 = vld [vmem:[%s962_s4] ss:$0 sm:$0xff] (!%p246_p3) }
   0xa   : > { %754 = vmatprep.subr.bf16.mxu1 (!%p246_p3), %v836_v1  ;;  %756 = vmatprep.mubr.msk.bf16.mxu1 (!%p246_p3), %vm837_vm0, %v836_v1  ;;  %v728_v46 = vld [vmem:[%s963_s5] ss:$0 sm:$0xff] (!%p246_p3) }
   0xc   : > { %747 = vmatpush3.bf16.msra.mxu0 (!%p246_p3), %v804_v3 }
   0xd   : > { %755 = vmatpush3.bf16.msra.mxu1 (!%p246_p3), %v805_v4  ;;  %760 = vmatprep.subr.bf16.mxu0 (!%p246_p3), %v836_v1 }
   0xe   : > { %s970_s21 = smov (!%p287_p4, %s826_s21), 1  ;;  %768 = vmatprep.subr.bf16.mxu1 %v836_v1 }
   0xf   : > { %s731_s9 = sshll.u32 %s970_s21, 4  ;;  %s697_s25 = sshll.u32 %s970_s21, 3 }
  0x10   : > { %s294_s14 = scalar_lea.vmem %s958_s0, %s731_s9  ;;  %s301_s28 = scalar_lea.vmem %s961_s3, %s697_s25 }
  0x11   : > { %v699_v7 = vld [vmem:[%s294_s14 + $0x4] sm:$0xf]  ;;  %v310_v8 = vld [vmem:[%s294_s14] sm:$0xf]  ;;  %v710_v11 = vld [vmem:[%s294_s14 + $0x8] sm:$0xf]  ;;  %s308_s13 = scalar_lea.vmem %s964_s6, %s697_s25 }
  0x12   : > { %749 = vmatmul.mubr.msk.bf16.vlgmr.msra.gmra.mrb[0].mxu0 %vm334_vm1, %v699_v7  ;;  %757 = vmatmul.mubr.msk.bf16.vlgmr.msra.gmra.mrb[0].mxu1 %vm334_vm1, %v310_v8  ;;  %v718_v12 = vld [vmem:[%s294_s14 + $0xc] sm:$0xf]  ;;  %v559_v26 = vld [vmem:[%s301_s28] sm:$0xff] }
  0x13   : > { %761 = vmatpush3.bf16.msra.mxu0 %v806_v5  ;;  %769 = vmatpush3.bf16.msra.mxu1 %v807_v6 }
  0x14   : > { %762 = vmatprep.subr.bf16.mxu0 %v836_v1  ;;  %770 = vmatprep.subr.bf16.mxu1 %v836_v1 }
  0x15   : > { %764 = vmatprep.mubr.msk.bf16.mxu0 %vm837_vm0, %v836_v1  ;;  %772 = vmatprep.mubr.msk.bf16.mxu1 %vm837_vm0, %v836_v1 }
  0x17   : > { %763 = vmatpush3.bf16.msra.mxu0 %v808_v9  ;;  %771 = vmatpush3.bf16.msra.mxu1 %v809_v10 }
  0x1a   : > { %765 = vmatmul.mubr.msk.bf16.vlgmr.msra.gmra.mrb[4].mxu0 %vm334_vm1, %v710_v11  ;;  %773 = vmatmul.mubr.msk.bf16.vlgmr.msra.gmra.mrb[4].mxu1 %vm334_vm1, %v718_v12 }
  0xe5   : > { %v372_v13 = vpop.f32.mrb[0].mxu0  ;;  %v427_v14 = vpop.f32.mrb[0].mxu1 }
  0xe6   : > { %v750_v15 = vpop.f32.mrb[1].mxu0  ;;  %v428_v16 = vadd.f32 %v427_v14, %v372_v13  ;;  %v758_v17 = vpop.f32.mrb[1].mxu1 }
  0xe7   : > { %v375_v18 = vpop.f32.mrb[2].mxu0  ;;  %v430_v19 = vpop.f32.mrb[2].mxu1 }
  0xe8   : > { %v751_v20 = vpop.f32.mrb[3].mxu0  ;;  %v759_v21 = vpop.f32.mrb[3].mxu1 }
  0xed   : > { %v489_v22 = vpop.f32.mrb[4].mxu0  ;;  %v552_v24 = vpop.f32.mrb[4].mxu1 }
  0xee   : > { %v495_v23 = vadd.f32 %v489_v22, %v428_v16  ;;  %v766_v25 = vpop.f32.mrb[5].mxu0  ;;  %v774_v27 = vpop.f32.mrb[5].mxu1 }
  0xef   : > { %v492_v28 = vpop.f32.mrb[6].mxu0  ;;  %v555_v30 = vpop.f32.mrb[6].mxu1 }
  0xf0   : > { %v558_v29 = vadd.f32 %v552_v24, %v495_v23  ;;  %v767_v31 = vpop.f32.mrb[7].mxu0  ;;  %v775_v32 = vpop.f32.mrb[7].mxu1 }
  0xf2   : > { %v560_v34 = vadd.f32 %v559_v26, %v558_v29 }
  0xf4   : > { %v568_v35 = vadd.f32 %v726_v33, %v560_v34 }
  0xf6   : > { %569 = vadd.xlane.f32.xlu0 %v568_v35 }
 0x183   : > { %v570_v36 = vpop.xlane.xlu0 %569 }
 0x184   : > { %v572_v37 = vmul.f32 0.0078125, %v570_v36 }
 0x186   : > { %v573_v38 = vsub.f32 %v568_v35, %v572_v37 }
 0x188   : > { %v574_v39 = vmul.f32 %v573_v38, %v573_v38 }
 0x18a   : > { %575 = vadd.xlane.f32.xlu0 %v574_v39 }
 0x217   : > { %v576_v40 = vpop.xlane.xlu0 %575 }
 0x218   : > { %v577_v41 = vmul.f32 0.0078125, %v576_v40 }
 0x21a   : > { %v578_v42 = vadd.f32 1e-05, %v577_v41 }
 0x21c   : > { %810 = vrsqrt.f32 %v578_v42 }
 0x226   : > { %v811_v43 = vpop.eup %810 }
 0x227   : > { %v580_v45 = vmul.f32 %v811_v43, %v573_v38 }
 0x229   : > { %v588_v47 = vmul.f32 %v727_v44, %v580_v45 }
 0x22b   : > { %v596_v48 = vadd.f32 %v728_v46, %v588_v47 }
 0x22d   : > { %597 = vst [vmem:[%s308_s13] sm:$0xff] %v596_v48 }
 0x22e PF: > { %s16_s23 = sadd.s32 1, %s834_s23   ;;  %s965_s21 = smov %s830_s22 }
 0x22f   : > { %p13_p5 = scmp.ge.s32.totalorder %s16_s23, 4   ;;  %s966_s22 = smov %s968_s24 }
 0x231   :  { %15 = sbr.rel (!%p13_p5) target bundleno = 2 (0x2), region = 83 }

</bundles_post_ra>
